<compile_context>
chip_gen: v7x
topology: tpu7x:2x2x1
jax: 0.10.0
libtpu: 0.0.40
codegen_flags: <defaults>
</compile_context>

<pallas_src>
import functools

import jax
import jax.numpy as jnp
from jax import lax
from jax.experimental import pallas as pl
from jax.experimental.pallas import tpu as pltpu

NUM_LENGTHS = 256  # Embedding(256, dim) in the module


def _length_predictor_kernel(enc_ref, len_ref, wt_ref, out_ref, acc_ref, *,
                             normalize):
    # enc_ref: [tT, bB, C]  native dtype (bf16/f32), streamed over grid axis 1
    # len_ref: [bB, 1]      int32 source lengths (resident)
    # wt_ref:  [C, 256]     f32 embed_length.weight^T (resident)
    # out_ref: [bB, 256]    f32
    # acc_ref: [bB, C]      f32 scratch accumulator (persists over the T axis)
    k = pl.program_id(1)

    @pl.when(k == 0)
    def _init():
        acc_ref[...] = jnp.zeros_like(acc_ref)

    t_tile, b_tile, _ = enc_ref.shape
    # Global time index of each row in this tile.  Rows with t >= length are
    # dropped with a select, which also makes the ragged last tile (T not a
    # multiple of t_tile -> undefined tail data) safe against NaN/Inf garbage.
    t_idx = lax.broadcasted_iota(jnp.int32, (t_tile, b_tile, 1), 0) + k * t_tile
    mask = t_idx < len_ref[...][None, :, :]                    # [tT, bB, 1]

    enc = enc_ref[...]                                         # native dtype
    masked = jnp.where(mask, enc, jnp.zeros((), enc.dtype))    # select pre-upcast
    acc_ref[...] += jnp.sum(masked.astype(jnp.float32), axis=0)

    @pl.when(k == pl.num_programs(1) - 1)
    def _finalize():
        counts = jnp.maximum(len_ref[...].astype(jnp.float32), 1.0)   # [bB, 1]
        pooled = acc_ref[...] * (1.0 / counts)                        # [bB, C]
        # F.linear(pooled, W) == pooled @ W.T  (W.T passed in as wt_ref)
        logits = jnp.dot(pooled, wt_ref[...],
                         preferred_element_type=jnp.float32)          # [bB, 256]
        if normalize:
            m = jnp.max(logits, axis=-1, keepdims=True)
            shifted = logits - m
            lse = jnp.log(jnp.sum(jnp.exp(shifted), axis=-1, keepdims=True))
            out_ref[...] = shifted - lse
        else:
            out_ref[...] = logits


def _vmem_budget(b_tile, C):
    """Generation-aware VMEM limit and streamed-tile byte budget."""
    try:
        phys = int(pltpu.get_tpu_info().vmem_capacity_bytes)
    except Exception:
        phys = 64 * 1024 * 1024  # conservative (v7x per-TC VMEM)
    # v5e/v6e (128 MiB physical) -> 96 MiB; v7x (64 MiB physical) -> 48 MiB.
    vmem_limit = int(min(phys * 3 // 4, 96 * 1024 * 1024))
    resident = (2 * C * NUM_LENGTHS * 4          # weight (double-buffered)
                + b_tile * C * 4                 # f32 accumulator scratch
                + 2 * b_tile * NUM_LENGTHS * 4   # output block
                + 2 * max(8, b_tile) * 128 * 4)  # lengths (layout padding slack)
    headroom = 2 * 1024 * 1024
    enc_budget = (vmem_limit - resident - headroom) // 2   # double-buffered
    enc_budget = int(max(1 << 20, min(enc_budget, 16 * 1024 * 1024)))
    return vmem_limit, enc_budget


def length_predictor_forward(normalize, encoder_out, encoder_padding_mask,
                             embed_length_weight, *, t_tile=None):
    """encoder_out: [T, B, C] (f32 or bf16); encoder_padding_mask: [B, T] bool
    (True = pad, fairseq suffix-padding convention); embed_length_weight:
    [256, C].  Returns [B, 256] f32 (log-probs if normalize)."""
    T, B, C = encoder_out.shape
    itemsize = jnp.dtype(encoder_out.dtype).itemsize

    # Tiny host-side glue (O(T*B) / O(C*256)).
    # TODO(synk): lengths-based masking assumes fairseq's suffix padding mask
    # (valid tokens form a prefix); arbitrary masks would need a streamed mask.
    lengths = jnp.sum(jnp.logical_not(encoder_padding_mask), axis=1)
    lengths = lengths.astype(jnp.int32).reshape(B, 1)                 # [B, 1]
    w_t = embed_length_weight.astype(jnp.float32).T                   # [C, 256]

    # Batch split: independent "parallel" chunks for v7x's second TensorCore;
    # on single-TC chips it only adds a couple of grid steps.
    if B >= 16 and B % 16 == 0:
        b_tile = B // 2            # multiple of 8 by construction
    else:
        b_tile = B
    num_b = B // b_tile

    vmem_limit, enc_budget = _vmem_budget(b_tile, C)
    if t_tile is None:
        rows = enc_budget // max(1, b_tile * C * itemsize)
        t_tile = max(8, (int(rows) // 8) * 8)
        t_tile = min(t_tile, 1024)             # bound per-step unroll/code size
    t_tile = int(min(max(int(t_tile), 1), T))
    num_t = pl.cdiv(T, t_tile)                 # ragged last tile masked in-kernel

    kernel = functools.partial(_length_predictor_kernel, normalize=normalize)

    cost = pl.CostEstimate(
        flops=int(2 * T * B * C + 2 * B * C * NUM_LENGTHS + B * C),
        transcendentals=int(B * NUM_LENGTHS) if normalize else 0,
        bytes_accessed=int(T * B * C * itemsize          # encoder_out stream
                           + B * 4                       # lengths
                           + C * NUM_LENGTHS * 4         # weight
                           + B * NUM_LENGTHS * 4),       # output
    )

    return pl.pallas_call(
        kernel,
        out_shape=jax.ShapeDtypeStruct((B, NUM_LENGTHS), jnp.float32),
        grid_spec=pltpu.PrefetchScalarGridSpec(
            num_scalar_prefetch=0,
            grid=(num_b, num_t),
            in_specs=[
                pl.BlockSpec((t_tile, b_tile, C), lambda bi, k: (k, bi, 0)),
                pl.BlockSpec((b_tile, 1), lambda bi, k: (bi, 0)),
                pl.BlockSpec((C, NUM_LENGTHS), lambda bi, k: (0, 0)),
            ],
            out_specs=pl.BlockSpec((b_tile, NUM_LENGTHS), lambda bi, k: (bi, 0)),
            scratch_shapes=[pltpu.VMEM((b_tile, C), jnp.float32)],
        ),
        compiler_params=pltpu.CompilerParams(
            dimension_semantics=("parallel", "arbitrary"),
            vmem_limit_bytes=vmem_limit,
        ),
        cost_estimate=cost,
    )(encoder_out, lengths, w_t)


def _reference_forward(normalize, encoder_out, encoder_padding_mask, w):
    enc = encoder_out.astype(jnp.float32)
    valid = (~encoder_padding_mask).astype(jnp.float32).T              # [T, B]
    counts = jnp.maximum(valid.sum(0), 1.0)                            # [B]
    pooled = (enc * valid[:, :, None]).sum(0) / counts[:, None]        # [B, C]
    logits = pooled @ w.astype(jnp.float32).T
    if normalize:
        return jax.nn.log_softmax(logits, axis=-1)
    return logits


def _run_case(key, T, B, C, dtype, t_tile):
    k_enc, k_w, k_len = jax.random.split(key, 3)
    encoder_out = jax.random.normal(k_enc, (T, B, C), dtype=jnp.float32)
    encoder_out = encoder_out.astype(dtype)
    lengths = jax.random.randint(k_len, (B,), minval=1, maxval=T + 1)
    encoder_padding_mask = jnp.arange(T)[None, :] >= lengths[:, None]  # [B, T]
    w = jax.random.normal(k_w, (NUM_LENGTHS, C), dtype=jnp.float32) * (C ** -0.5)

    out_norm = length_predictor_forward(True, encoder_out,
                                        encoder_padding_mask, w, t_tile=t_tile)
    out_raw = length_predictor_forward(False, encoder_out,
                                       encoder_padding_mask, w, t_tile=t_tile)
    jax.block_until_ready((out_norm, out_raw))

    ref_norm = _reference_forward(True, encoder_out, encoder_padding_mask, w)
    ref_raw = _reference_forward(False, encoder_out, encoder_padding_mask, w)
    assert out_norm.shape == (B, NUM_LENGTHS)
    assert out_raw.shape == (B, NUM_LENGTHS)
    assert jnp.allclose(out_norm, ref_norm, atol=1e-4, rtol=1e-4), "norm mismatch"
    assert jnp.allclose(out_raw, ref_raw, atol=1e-4, rtol=1e-4), "raw mismatch"


if __name__ == "__main__":
    key = jax.random.PRNGKey(0)
    k0, k1, k2 = jax.random.split(key, 3)

    # Case 1: module-scale toy shapes (seq=8, batch=2, hidden=32), bf16 input,
    #         single T tile.
    _run_case(k0, T=8, B=2, C=32, dtype=jnp.bfloat16, t_tile=None)

    # Case 2: ragged multi-tile streaming without any device-side padding
    #         (T=40 -> tiles covering 16/16/8 valid rows), f32 input.
    _run_case(k1, T=40, B=4, C=64, dtype=jnp.float32, t_tile=16)

    # Case 3: exercises the batch-parallel grid axis (B=16 -> two chunks of 8,
    #         feeds both TensorCores on v7x) plus a ragged T tail, bf16 input.
    _run_case(k2, T=24, B=16, C=128, dtype=jnp.bfloat16, t_tile=16)

    print("KERNEL_OK")
</pallas_src>

<mosaic_0001>
module attributes {stable_mosaic.version = 11 : i64} {
  func.func @_length_predictor_kernel(%arg0: i32, %arg1: i32, %arg2: memref<8x2x32xbf16, #tpu.memory_space<vmem>>, %arg3: memref<2x1xi32, #tpu.memory_space<vmem>>, %arg4: memref<32x256xf32, #tpu.memory_space<vmem>>, %arg5: memref<2x256xf32, #tpu.memory_space<vmem>>, %arg6: memref<2x32xf32, #tpu.memory_space<vmem>>) attributes {dimension_semantics = [#tpu.dimension_semantics<parallel>, #tpu.dimension_semantics<arbitrary>], iteration_bounds = array<i64: 1, 1>, scalar_prefetch = 0 : i64, scratch_operands = 1 : i64, tpu.core_type = #tpu.core_type<tc>, window_params = [{transform_indices = @transform_0, window_bounds = array<i64: 8, 2, 32>}, {transform_indices = @transform_1, window_bounds = array<i64: 2, 1>}, {pipeline_mode = #tpu.pipeline_mode<synchronous>, transform_indices = @transform_2, window_bounds = array<i64: 32, 256>}, {transform_indices = @transform_3, window_bounds = array<i64: 2, 256>}]} {
    %c0_i32 = arith.constant 0 : i32
    %0 = arith.cmpi eq, %arg1, %c0_i32 : i32
    %1 = arith.extui %0 : i1 to i32
    %c0_i32_0 = arith.constant 0 : i32
    %2 = arith.cmpi ne, %1, %c0_i32_0 : i32
    scf.if %2 {
      %cst_12 = arith.constant 0.000000e+00 : f32
      %24 = vector.broadcast %cst_12 : f32 to vector<2x32xf32>
      %c0_13 = arith.constant 0 : index
      %c0_14 = arith.constant 0 : index
      %25 = vector.load %arg6[%c0_13, %c0_14] : memref<2x32xf32, #tpu.memory_space<vmem>>, vector<2x32xf32>
      tpu.vector_store %arg6[%c0_13, %c0_14], %24 {strides = array<i32>} : memref<2x32xf32, #tpu.memory_space<vmem>>, vector<2x32xf32>,
    } else {
    }
    %3 = tpu.iota {dimensions = array<i32: 0>} : vector<8x2x1xi32>
    %c8_i32 = arith.constant 8 : i32
    %4 = arith.muli %arg1, %c8_i32 : i32
    %5 = vector.broadcast %4 : i32 to vector<8x2x1xi32>
    %6 = arith.addi %3, %5 : vector<8x2x1xi32>
    %c0 = arith.constant 0 : index
    %c0_1 = arith.constant 0 : index
    %7 = vector.load %arg3[%c0, %c0_1] : memref<2x1xi32, #tpu.memory_space<vmem>>, vector<2x1xi32>
    %8 = vector.shape_cast %7 : vector<2x1xi32> to vector<1x2x1xi32>
    %9 = vector.broadcast %8 : vector<1x2x1xi32> to vector<8x2x1xi32>
    %10 = arith.cmpi slt, %6, %9 : vector<8x2x1xi32>
    %c0_2 = arith.constant 0 : index
    %c0_3 = arith.constant 0 : index
    %c0_4 = arith.constant 0 : index
    %11 = vector.load %arg2[%c0_2, %c0_3, %c0_4] : memref<8x2x32xbf16, #tpu.memory_space<vmem>>, vector<8x2x32xbf16>
    %cst = arith.constant 0.000000e+00 : bf16
    %12 = vector.shape_cast %10 : vector<8x2x1xi1> to vector<8x2x1xi1>
    %13 = vector.broadcast %12 : vector<8x2x1xi1> to vector<8x2x32xi1>
    %14 = vector.broadcast %cst : bf16 to vector<8x2x32xbf16>
    %15 = arith.select %13, %11, %14 : vector<8x2x32xi1>, vector<8x2x32xbf16>
    %c0_5 = arith.constant 0 : index
    %c0_6 = arith.constant 0 : index
    %16 = vector.load %arg6[%c0_5, %c0_6] : memref<2x32xf32, #tpu.memory_space<vmem>>, vector<2x32xf32>
    %17 = arith.extf %15 : vector<8x2x32xbf16> to vector<8x2x32xf32>
    %cst_7 = arith.constant dense<0.000000e+00> : vector<2x32xf32>
    %18 = vector.multi_reduction <add>, %17, %cst_7 [0] : vector<8x2x32xf32> to vector<2x32xf32>
    %19 = arith.addf %16, %18 : vector<2x32xf32>
    %c0_8 = arith.constant 0 : index
    %c0_9 = arith.constant 0 : index
    %20 = vector.load %arg6[%c0_8, %c0_9] : memref<2x32xf32, #tpu.memory_space<vmem>>, vector<2x32xf32>
    tpu.vector_store %arg6[%c0_8, %c0_9], %19 {strides = array<i32>} : memref<2x32xf32, #tpu.memory_space<vmem>>, vector<2x32xf32>,
    %c0_i32_10 = arith.constant 0 : i32
    %21 = arith.cmpi eq, %arg1, %c0_i32_10 : i32
    %22 = arith.extui %21 : i1 to i32
    %c0_i32_11 = arith.constant 0 : i32
    %23 = arith.cmpi ne, %22, %c0_i32_11 : i32
    scf.if %23 {
      %c0_12 = arith.constant 0 : index
      %c0_13 = arith.constant 0 : index
      %24 = vector.load %arg3[%c0_12, %c0_13] : memref<2x1xi32, #tpu.memory_space<vmem>>, vector<2x1xi32>
      %25 = arith.sitofp %24 : vector<2x1xi32> to vector<2x1xf32>
      %cst_14 = arith.constant 1.000000e+00 : f32
      %26 = vector.broadcast %cst_14 : f32 to vector<2x1xf32>
      %27 = arith.maximumf %25, %26 : vector<2x1xf32>
      %c0_15 = arith.constant 0 : index
      %c0_16 = arith.constant 0 : index
      %28 = vector.load %arg6[%c0_15, %c0_16] : memref<2x32xf32, #tpu.memory_space<vmem>>, vector<2x32xf32>
      %cst_17 = arith.constant 1.000000e+00 : f32
      %29 = vector.broadcast %cst_17 : f32 to vector<2x1xf32>
      %30 = arith.divf %29, %27 : vector<2x1xf32>
      %31 = vector.broadcast %30 : vector<2x1xf32> to vector<2x32xf32>
      %32 = arith.mulf %28, %31 : vector<2x32xf32>
      %c0_18 = arith.constant 0 : index
      %c0_19 = arith.constant 0 : index
      %33 = vector.load %arg4[%c0_18, %c0_19] : memref<32x256xf32, #tpu.memory_space<vmem>>, vector<32x256xf32>
      %cst_20 = arith.constant dense<0.000000e+00> : vector<2x256xf32>
      %34 = tpu.matmul %32, %33, %cst_20 {dimension_numbers = #tpu.dot_dimension_numbers<[1], [0], [0], [1], [0, 0, 1, 1], [], []>} : vector<2x32xf32>, vector<32x256xf32>, vector<2x256xf32> -> vector<2x256xf32>
      %cst_21 = arith.constant dense<0xFF800000> : vector<2xf32>
      %35 = vector.multi_reduction <maximumf>, %34, %cst_21 [1] : vector<2x256xf32> to vector<2xf32>
      %36 = vector.shape_cast %35 : vector<2xf32> to vector<2x1xf32>
      %37 = vector.broadcast %36 : vector<2x1xf32> to vector<2x256xf32>
      %38 = arith.subf %34, %37 : vector<2x256xf32>
      %39 = math.exp %38 : vector<2x256xf32>
      %cst_22 = arith.constant dense<0.000000e+00> : vector<2xf32>
      %40 = vector.multi_reduction <add>, %39, %cst_22 [1] : vector<2x256xf32> to vector<2xf32>
      %41 = vector.shape_cast %40 : vector<2xf32> to vector<2x1xf32>
      %42 = math.log %41 : vector<2x1xf32>
      %43 = vector.broadcast %42 : vector<2x1xf32> to vector<2x256xf32>
      %44 = arith.subf %38, %43 : vector<2x256xf32>
      %c0_23 = arith.constant 0 : index
      %c0_24 = arith.constant 0 : index
      %45 = vector.load %arg5[%c0_23, %c0_24] : memref<2x256xf32, #tpu.memory_space<vmem>>, vector<2x256xf32>
      tpu.vector_store %arg5[%c0_23, %c0_24], %44 {strides = array<i32>} : memref<2x256xf32, #tpu.memory_space<vmem>>, vector<2x256xf32>,
    } else {
    }
    return
  }
  func.func @transform_0(%arg0: i32, %arg1: i32) -> (i32, i32, i32) {
    %c0_i32 = arith.constant 0 : i32
    %c0_i32_0 = arith.constant 0 : i32
    return %arg1, %arg0, %c0_i32 : i32, i32, i32
  }
  func.func @transform_1(%arg0: i32, %arg1: i32) -> (i32, i32) {
    %c0_i32 = arith.constant 0 : i32
    %c0_i32_0 = arith.constant 0 : i32
    return %arg0, %c0_i32 : i32, i32
  }
  func.func @transform_2(%arg0: i32, %arg1: i32) -> (i32, i32) {
    %c0_i32 = arith.constant 0 : i32
    %c0_i32_0 = arith.constant 0 : i32
    %c0_i32_1 = arith.constant 0 : i32
    return %c0_i32, %c0_i32_0 : i32, i32
  }
  func.func @transform_3(%arg0: i32, %arg1: i32) -> (i32, i32) {
    %c0_i32 = arith.constant 0 : i32
    %c0_i32_0 = arith.constant 0 : i32
    return %arg0, %c0_i32 : i32, i32
  }
}

</mosaic_0001>

<bundles_post_ra>
// kernel: tpu_custom_call.1
= control target key start
LH: loop header
LB: loop body
LE: loop exit
PB: predicated region body
PF: predicated region fallthrough
CT: control target
= control target key end

     0   :  { %8 = vsyncpa [#allocation4], 0  ;;  %s539_s0 = inlined_call_operand.hbm [shape: bf16[8,2,32], index: 0, kind: input, shape index: {}]   ;;  %s540_s1 = inlined_call_operand.vmem [shape: s32[2,1], index: 1, kind: input, shape index: {}]   ;;  %s541_s2 = inlined_call_operand.hbm [shape: f32[32,256], index: 2, kind: input, shape index: {}]   ;;  %s542_s3 = inlined_call_operand.hbm [shape: f32[2,256], index: 3, kind: output, shape index: {}]  }
   0x1   :  { %9 = vsyncpa [#allocation7], 0 }
   0x2   :  { %10 = vsyncpa [#allocation5], 0  ;;  %s431_s12 = smov [#allocation3]   ;;  %s359_s16 = scalar_lea.hbm %s539_s0, 128 }
   0x3   :  { %s16_s13 = sshll.u32 %s431_s12, 4  ;;  %p360_p0 = scmp.ne.s32.totalorder %s539_s0, %s359_s16  ;;  %s17_s13 = int_to_ptr.vmem [resolvable:$true] %s16_s13 }
   0x4   :  { %p363_p1 = scmp.lt.u32.totalorder %s359_s16, %s539_s0 }
   0x6   :  { %p365_p2 = pnand %p363_p1, %p360_p0 }
   0x8   :  { %368 = shalt.err (!%p365_p2)
}
   0x9   :  { %s369_s21 = scalar_lea.vmem %s17_s13, 128  ;;  %p374_p4 = scmp.lt.s32.totalorder %s17_s13, %s17_s13 }
   0xa   :  { %p370_p3 = scmp.ne.s32.totalorder %s17_s13, %s369_s21  ;;  %p375_p5 = scmp.lt.s32.totalorder %s369_s21, %s369_s21 }
   0xc   :  { %p376_p6 = por %p375_p5, %p374_p4 }
   0xe   :  { %p377_p7 = pnand %p376_p6, %p370_p3 }
  0x10   :  { %380 = shalt.err (!%p377_p7)
}
  0x11   :  { %s432_s22 = smov 16   ;;  %s433_s23 = smov 1  }
  0x12   :  { %22 = dma.hbm_to_vmem [thread:$0]  %s539_s0, 128, %s17_s13, [#allocation4], %s432_s22, %s432_s22, %s433_s23  }
  0x13   :  { %s434_s26 = smov [#allocation6]   ;;  %s381_s30 = scalar_lea.hbm %s541_s2, 1024 }
  0x14   :  { %s30_s27 = sshll.u32 %s434_s26, 4  ;;  %p382_p8 = scmp.ne.s32.totalorder %s541_s2, %s381_s30  ;;  %s31_s27 = int_to_ptr.vmem [resolvable:$true] %s30_s27 }
  0x15   :  { %p385_p9 = scmp.lt.u32.totalorder %s381_s30, %s541_s2 }
  0x17   :  { %p387_p10 = pnand %p385_p9, %p382_p8 }
  0x19   :  { %390 = shalt.err (!%p387_p10)
}
  0x1a   :  { %s391_s8 = scalar_lea.vmem %s31_s27, 1024  ;;  %p396_p12 = scmp.lt.s32.totalorder %s31_s27, %s31_s27 }
  0x1b   :  { %p392_p11 = scmp.ne.s32.totalorder %s31_s27, %s391_s8  ;;  %p397_p13 = scmp.lt.s32.totalorder %s391_s8, %s391_s8 }
  0x1d   :  { %p398_p0 = por %p397_p13, %p396_p12 }
  0x1f   :  { %p399_p1 = pnand %p398_p0, %p392_p11 }
  0x21   :  { %402 = shalt.err (!%p399_p1)
}
  0x22   :  { %s435_s0 = smov 256  }
  0x23   :  { %36 = dma.hbm_to_vmem [thread:$0]  %s541_s2, 1024, %s31_s27, [#allocation7], %s435_s0, %s435_s0, %s432_s22  }
  0x24   :  { %425 = dma.done.wait [#allocation4], 128  }
  0x25   :  { %426 = vsyncadd [#allocation4], 4294967168 }
  0x26   :  { %427 = dma.done.wait [#allocation7], 1024  }
  0x27   :  { %428 = vsyncadd [#allocation7], 4294966272  ;;  %v436_v0 = vmov 0   ;;  %v60_v1 = vld [vmem:[%s540_s1] sm:$0x3]  ;;  %vm49_vm8 = vcmask 254976  }
  0x28   :  { %350 = vset.pattern.permute.xlu1 %v436_v0  ;;  %349 = vset.pattern.permute.xlu0 %v436_v0  ;;  %vm325_vm0 = vcmp.gt.s32.totalorder %v60_v1, 2  ;;  %vm323_vm1 = vcmp.gt.s32.totalorder %v60_v1, 0  ;;  %vm326_vm2 = vcmp.gt.s32.totalorder %v60_v1, 3  ;;  %vm324_vm3 = vcmp.gt.s32.totalorder %v60_v1, 1  ;;  %v179_v4 = vld [vmem:[%s540_s1] sm:$0x3] }
  0x29   :  { %v79_v2 = vsel %vm325_vm0, 1, %v436_v0  ;;  %v77_v3 = vsel %vm323_vm1, 1, %v436_v0  ;;  %v80_v5 = vsel %vm326_vm2, 1, %v436_v0  ;;  %v78_v6 = vsel %vm324_vm3, 1, %v436_v0  ;;  %v192_v15 = vld [vmem:[#allocation6 + $0x8] sm:$0xff]  ;;  %v194_v16 = vld [vmem:[#allocation6 + $0x18] sm:$0xff] }
  0x2a   :  { %92 = vperm.xlu1 %350, %v79_v2   ;;  %86 = vperm.xlu0 %349, %v77_v3   ;;  %vm328_vm4 = vcmp.gt.s32.totalorder %v60_v1, 5  ;;  %vm327_vm5 = vcmp.gt.s32.totalorder %v60_v1, 4  ;;  %v180_v7 = vcvt.s32.f32 %v179_v4  ;;  %vm330_vm6 = vcmp.gt.s32.totalorder %v60_v1, 7  ;;  %v191_v18 = vld [vmem:[#allocation6] sm:$0xff]  ;;  %v193_v19 = vld [vmem:[#allocation6 + $0x10] sm:$0xff]  ;;  %v196_v21 = vld [vmem:[#allocation6 + $0x28] sm:$0xff] }
  0x2b   :  { %v82_v9 = vsel %vm328_vm4, 1, %v436_v0  ;;  %v81_v10 = vsel %vm327_vm5, 1, %v436_v0  ;;  %vm329_vm7 = vcmp.gt.s32.totalorder %v60_v1, 6  ;;  %v84_v11 = vsel %vm330_vm6, 1, %v436_v0  ;;  %v198_v22 = vld [vmem:[#allocation6 + $0x38] sm:$0xff]  ;;  %v195_v24 = vld [vmem:[#allocation6 + $0x20] sm:$0xff] }
  0x2c   :  { %v181_v8 = vmax.f32 %v180_v7, 1.0  ;;  %v83_v12 = vsel %vm329_vm7, 1, %v436_v0  ;;  %v437_v14 = vmov 0.0   ;;  %v333_v17 = vpack.c.bf16 %v194_v16, %v192_v15  ;;  %v197_v25 = vld [vmem:[#allocation6 + $0x30] sm:$0xff]  ;;  %v71_v31 = vld [vmem:[#allocation3 + $0x2] sm:$0x1] }
  0x2d   :  { %50 = vst.msk [vmem:[#allocation2] sm:$0x3] %vm49_vm8, %v437_v14  ;;  %267 = vmatprep.mubr.f32.mxu0 %v437_v14  ;;  %v335_v20 = vpack.c.bf16 %v193_v19, %v191_v18  ;;  %v337_v23 = vpack.c.bf16 %v198_v22, %v196_v21  ;;  %v339_v26 = vpack.c.bf16 %v197_v25, %v195_v24  ;;  %v69_v33 = vld [vmem:[#allocation3] sm:$0x1]  ;;  %v72_v41 = vld [vmem:[#allocation3 + $0x3] sm:$0x1] }
  0x2e   :  { %95 = vperm.xlu1 %350, %v80_v5   ;;  %89 = vperm.xlu0 %349, %v78_v6   ;;  %351 = vrcp.f32 %v181_v8  ;;  %v70_v43 = vld [vmem:[#allocation3 + $0x1] sm:$0x1]  ;;  %v74_v57 = vld [vmem:[#allocation3 + $0x5] sm:$0x1]  ;;  %v73_v59 = vld [vmem:[#allocation3 + $0x4] sm:$0x1] }
  0x2f   :  { %334 = vmatprep.subr.bf16.mxu0 %v333_v17  ;;  %v76_v6 = vld [vmem:[#allocation3 + $0x7] sm:$0x1]  ;;  %v75_v14 = vld [vmem:[#allocation3 + $0x6] sm:$0x1]  ;;  %s438_s1 = smov [#allocation8]  }
  0x30   :  { %336 = vmatpush1.bf16.msra.mxu0 %v335_v20  ;;  %s313_s14 = sshll.u32 %s438_s1, 4  ;;  %s314_s14 = int_to_ptr.vmem [resolvable:$true] %s313_s14 }
  0x31   :  { %338 = vmatprep.subr.bf16.mxu0 %v337_v23  ;;  %s403_s15 = scalar_lea.vmem %s314_s14, 64  ;;  %p408_p3 = scmp.lt.s32.totalorder %s314_s14, %s314_s14 }
  0x32   :  { %101 = vperm.xlu1 %350, %v82_v9   ;;  %98 = vperm.xlu0 %349, %v81_v10   ;;  %p404_p2 = scmp.ne.s32.totalorder %s314_s14, %s403_s15  ;;  %p409_p4 = scmp.lt.s32.totalorder %s403_s15, %s403_s15 }
  0x34   :  { %340 = vmatpush1.bf16.msra.mxu0 %v339_v26  ;;  %v149_v26 = vld [vmem:[#allocation2] sm:$0x3]  ;;  %p410_p5 = por %p409_p4, %p408_p3 }
  0x36   :  { %107 = vperm.xlu1 %350, %v84_v11   ;;  %104 = vperm.xlu0 %349, %v83_v12   ;;  %p411_p6 = pnand %p410_p5, %p404_p2 }
  0x38   :  { %v352_v13 = vpop.eup %351 }
  0x3a   :  { %187 = vperm.xlu0 %349, %v352_v13  }
  0xa9   :  { %v93_v27 = vpop.permute.xlu1 %92  ;;  %v87_v28 = vpop.permute.xlu0 %86 }
  0xaa   :  { %vm111_vm9 = vcmp.eq.s32.totalorder %v93_v27, 1  ;;  %vm109_vm10 = vcmp.eq.s32.totalorder %v87_v28, 1 }
  0xab   :  { %v119_v29 = vsel %vm111_vm9, 1, %v436_v0  ;;  %v117_v30 = vsel %vm109_vm10, 1, %v436_v0  ;;  %vm199_vm10 = vcmask 261120  }
  0xac   :  { %v127_v32 = vpack.c.b16 %v119_v29, %v119_v29  ;;  %v125_v34 = vpack.c.b16 %v117_v30, %v117_v30 }
  0xad   :  { %v96_v35 = vpop.permute.xlu1 %95  ;;  %v90_v36 = vpop.permute.xlu0 %89 }
  0xae   :  { %vm135_vm11 = vcmp.ne.s16.totalorder %v127_v32, 0  ;;  %vm133_vm12 = vcmp.ne.s16.totalorder %v125_v34, 0  ;;  %vm112_vm13 = vcmp.eq.s32.totalorder %v96_v35, 1  ;;  %vm110_vm14 = vcmp.eq.s32.totalorder %v90_v36, 1 }
  0xaf   :  { %v143_v37 = vsel %vm135_vm11, %v71_v31, 0  ;;  %v141_v38 = vsel %vm133_vm12, %v69_v33, 0  ;;  %v120_v39 = vsel %vm112_vm13, 1, %v436_v0  ;;  %v118_v40 = vsel %vm110_vm14, 1, %v436_v0 }
  0xb0   :  { %v128_v42 = vpack.c.b16 %v120_v39, %v120_v39  ;;  %v126_v44 = vpack.c.b16 %v118_v40, %v118_v40  ;;  %v152_v45 = vunpack.c.l.bf16 %v143_v37  ;;  %v150_v46 = vunpack.c.l.bf16 %v141_v38 }
  0xb1   :  { %v102_v47 = vpop.permute.xlu1 %101  ;;  %v99_v48 = vpop.permute.xlu0 %98  ;;  %vm274_vm11 = vcmask 1041408  }
  0xb2   :  { %vm504_vm15 = vcmp.ne.s16.totalorder %v128_v42, 0  ;;  %vm134_vm0 = vcmp.ne.s16.totalorder %v126_v44, 0  ;;  %vm114_vm1 = vcmp.eq.s32.totalorder %v102_v47, 1  ;;  %vm113_vm2 = vcmp.eq.s32.totalorder %v99_v48, 1 }
  0xb3   :  { %v144_v50 = vsel %vm504_vm15, %v72_v41, 0  ;;  %v142_v51 = vsel %vm134_vm0, %v70_v43, 0  ;;  %v122_v53 = vsel %vm114_vm1, 1, %v436_v0  ;;  %v121_v54 = vsel %vm113_vm2, 1, %v436_v0 }
  0xb4   :  { %v151_v52 = vunpack.c.l.bf16 %v142_v51  ;;  %v162_v55 = vsel %vm49_vm8, %v152_v45, 0.0  ;;  %v159_v56 = vsel %vm49_vm8, %v150_v46, 0.0  ;;  %v130_v58 = vpack.c.b16 %v122_v53, %v122_v53 }
  0xb5   :  { %v129_v60 = vpack.c.b16 %v121_v54, %v121_v54  ;;  %v108_v61 = vpop.permute.xlu1 %107  ;;  %v105_v62 = vpop.permute.xlu0 %104  ;;  %v153_v63 = vunpack.c.l.bf16 %v144_v50 }
  0xb6   :  { %v160_v1 = vsel %vm49_vm8, %v151_v52, 0.0  ;;  %vm116_vm3 = vcmp.eq.s32.totalorder %v108_v61, 1  ;;  %vm115_vm4 = vcmp.eq.s32.totalorder %v105_v62, 1  ;;  %vm138_vm5 = vcmp.ne.s16.totalorder %v130_v58, 0 }
  0xb7   :  { %v161_v2 = vadd.f32 %v160_v1, %v159_v56  ;;  %vm137_vm6 = vcmp.ne.s16.totalorder %v129_v60, 0  ;;  %v124_v3 = vsel %vm116_vm3, 1, %v436_v0  ;;  %v146_v4 = vsel %vm138_vm5, %v74_v57, 0 }
  0xb8   :  { %v145_v5 = vsel %vm137_vm6, %v73_v59, 0  ;;  %v132_v7 = vpack.c.b16 %v124_v3, %v124_v3  ;;  %v123_v8 = vsel %vm115_vm4, 1, %v436_v0  ;;  %v164_v12 = vsel %vm49_vm8, %v153_v63, 0.0 }
  0xb9   :  { %v163_v9 = vadd.f32 %v162_v55, %v161_v2  ;;  %v154_v10 = vunpack.c.l.bf16 %v145_v5  ;;  %v131_v11 = vpack.c.b16 %v123_v8, %v123_v8  ;;  %v155_v13 = vunpack.c.l.bf16 %v146_v4  ;;  %v188_v29 = vpop.permute.xlu0 %187 }
  0xba   :  { %vm140_vm7 = vcmp.ne.s16.totalorder %v132_v7, 0 }
  0xbb   :  { %v165_v15 = vadd.f32 %v164_v12, %v163_v9  ;;  %v148_v16 = vsel %vm140_vm7, %v76_v6, 0  ;;  %v166_v17 = vsel %vm49_vm8, %v154_v10, 0.0  ;;  %vm139_vm9 = vcmp.ne.s16.totalorder %v131_v11, 0 }
  0xbc   :  { %v147_v19 = vsel %vm139_vm9, %v75_v14, 0  ;;  %v168_v20 = vsel %vm49_vm8, %v155_v13, 0.0  ;;  %v157_v21 = vunpack.c.l.bf16 %v148_v16 }
  0xbd   :  { %v167_v18 = vadd.f32 %v166_v17, %v165_v15  ;;  %v156_v22 = vunpack.c.l.bf16 %v147_v19 }
  0xbe   :  { %v172_v25 = vsel %vm49_vm8, %v157_v21, 0.0 }
  0xbf   :  { %v169_v0 = vadd.f32 %v168_v20, %v167_v18  ;;  %v170_v23 = vsel %vm49_vm8, %v156_v22, 0.0 }
  0xc1   :  { %v171_v24 = vadd.f32 %v170_v23, %v169_v0 }
  0xc3   :  { %v173_v27 = vadd.f32 %v172_v25, %v171_v24 }
  0xc5   :  { %v174_v28 = vadd.f32 %v173_v27, %v149_v26 }
  0xc7   :  { %175 = vst.msk [vmem:[#allocation2] sm:$0x3] %vm49_vm8, %v174_v28 }
  0xce   :  { %v182_v30 = vld [vmem:[#allocation2] sm:$0x3] }
  0xcf   :  { %v190_v31 = vmul.f32 %v188_v29, %v182_v30 }
  0xd1   :  { %331 = vmatmul.mubr.msk.f32.vlgmr.msra.gmra.mrb[0].mxu0 %vm199_vm10, %v190_v31 }
 0x1a4   :  { %v269_v32 = vpop.f32.mrb[0].mxu0 }
 0x1a5   :  { %v275_v33 = vsel %vm274_vm11, %v269_v32, -inf  ;;  %v271_v34 = vpop.f32.mrb[1].mxu0 }
 0x1a6   :  { %v276_v35 = vsel %vm274_vm11, %v271_v34, -inf }
 0x1a7   :  { %v277_v36 = vmax.f32 %v275_v33, %v276_v35 }
 0x1a9   :  { %278 = vmax.xlane.f32.xlu1 %v277_v36 }
 0x236   :  { %v279_v37 = vpop.xlane.xlu1 %278 }
 0x237   :  { %v280_v38 = vsub.f32 %v269_v32, %v279_v37  ;;  %v281_v39 = vsub.f32 %v271_v34, %v279_v37 }
 0x239   :  { %v282_v40 = vmul.f32 1.442695, %v280_v38  ;;  %v284_v41 = vmul.f32 1.442695, %v281_v39 }
 0x23b   :  { %353 = vpow2.f32 %v282_v40 }
 0x23c   :  { %355 = vpow2.f32 %v284_v41 }
 0x245   :  { %v354_v42 = vpop.eup %353 }
 0x246   :  { %v356_v43 = vpop.eup %355  ;;  %v286_v44 = vsel %vm274_vm11, %v354_v42, 0.0 }
 0x247   :  { %v287_v45 = vsel %vm274_vm11, %v356_v43, 0.0 }
 0x248   :  { %v288_v46 = vadd.f32 %v287_v45, %v286_v44 }
 0x24a   :  { %289 = vadd.xlane.f32.xlu0 %v288_v46 }
 0x2d7   :  { %v290_v47 = vpop.xlane.xlu0 %289 }
 0x2d8   :  { %357 = vlog2.f32 %v290_v47 }
 0x2e2   :  { %v358_v48 = vpop.eup %357 }
 0x2e3   :  { %v292_v49 = vmul.f32 0.6931472, %v358_v48 }
 0x2e5   :  { %v293_v50 = vsub.f32 %v280_v38, %v292_v49  ;;  %v294_v51 = vsub.f32 %v281_v39, %v292_v49 }
 0x2e7   :  { %v297_v52 = vcombine.low %v293_v50, %v294_v51 }
 0x2e9   :  { %332 = vst.sshfl [vmem:[#allocation8] sm:$0x33 pattern:$0x76325410] %v297_v52 }
 0x2ea   :  { %414 = shalt.err (!%p411_p6)
}
 0x2eb   :  { %s415_s18 = scalar_lea.hbm %s542_s3, 64 }
 0x2ec   :  { %p416_p7 = scmp.ne.s32.totalorder %s542_s3, %s415_s18  ;;  %p419_p8 = scmp.lt.u32.totalorder %s415_s18, %s542_s3 }
 0x2ee   :  { %p421_p9 = pnand %p419_p8, %p416_p7 }
 0x2f0   :  { %424 = shalt.err (!%p421_p9)
}
 0x2f1   :  { %316 = dma.vmem_to_hbm [thread:$0]  %s314_s14, 64, %s542_s3, [#allocation5]  }
 0x2f2   :  { %429 = dma.done.wait [#allocation5], 64  }
 0x2f3   :  { %430 = vsyncadd [#allocation5], 4294967232 }
 0x2f4   :  { %320 = vsyncpa [#allocation4], 1 }
 0x2f5   :  { %321 = vsyncpa [#allocation7], 1 }
 0x2f6   :  { %322 = vsyncpa [#allocation5], 1 }

</bundles_post_ra>
